<compile_context>
chip_gen: v7x
topology: tpu7x:2x2x1
jax: 0.10.0
libtpu: 0.0.40
codegen_flags: <defaults>
</compile_context>

<pallas_src>
import functools

import jax
import jax.numpy as jnp
from jax.experimental import pallas as pl
from jax.experimental.pallas import tpu as pltpu


def _round_up(x, m):
    return (x + m - 1) // m * m


# ----------------------------------------------------------------------------
# Small-batch path: whole problem in one kernel invocation (no grid).
# ----------------------------------------------------------------------------
def _erm_fc_small_kernel(x_ref, w1_ref, gamma_ref, beta_ref, w2_ref, b2_ref,
                         o_ref, *, train: bool, n_valid: int, eps: float = 1e-5):
    # linear1 (bf16 operands, f32 MXU accumulation). b1 omitted: cancelled by
    # the batch-mean subtraction of training-mode BatchNorm.
    h = jnp.dot(x_ref[...].astype(jnp.bfloat16), w1_ref[...],
                preferred_element_type=jnp.float32)              # (B, H) f32
    inv_n = jnp.float32(1.0 / n_valid)
    mean = jnp.sum(h, axis=0, keepdims=True) * inv_n
    var = jnp.maximum(jnp.sum(h * h, axis=0, keepdims=True) * inv_n
                      - mean * mean, 0.0)
    scale = gamma_ref[...] * jax.lax.rsqrt(var + eps)            # (1, H)
    shift = beta_ref[...] - mean * scale
    hn = jnp.maximum(h * scale + shift, 0.0)                     # BN FMA + ReLU
    out = jnp.dot(hn.astype(jnp.bfloat16), w2_ref[...],
                  preferred_element_type=jnp.float32) + b2_ref[...]
    if not train:
        out = jnp.tanh(jnp.clip(out, -1.0, 1.0))
    o_ref[...] = out.astype(o_ref.dtype)


# ----------------------------------------------------------------------------
# Large-batch path: two-phase grid (phase 0 = linear1 + streamed stats,
# phase 1 = finalize stats once, then BN + ReLU + linear2 per B-tile).
# ----------------------------------------------------------------------------
def _erm_fc_tiled_kernel(x_ref, w1_ref, gamma_ref, beta_ref, w2_ref, b2_ref,
                         o_ref, h_ref, sum_ref, sq_ref, scale_ref, shift_ref,
                         *, train: bool, n_valid: int, eps: float = 1e-5):
    p = pl.program_id(0)          # phase
    b = pl.program_id(1)          # batch-tile index

    @pl.when(p == 0)
    def _phase0():
        @pl.when(b == 0)
        def _init():
            sum_ref[...] = jnp.zeros_like(sum_ref)
            sq_ref[...] = jnp.zeros_like(sq_ref)

        h = jnp.dot(x_ref[...].astype(jnp.bfloat16), w1_ref[...],
                    preferred_element_type=jnp.float32)          # (TB, H) f32
        # Streamed BN statistics (f32 accumulators). Zero-padded batch rows
        # have h == 0 (b1 dropped) so they contribute nothing.
        sum_ref[...] += jnp.sum(h, axis=0, keepdims=True)
        sq_ref[...] += jnp.sum(h * h, axis=0, keepdims=True)
        # Persist the tile for phase 1 (bf16 to halve VMEM / reload BW).
        h_ref[b] = h.astype(h_ref.dtype)
        # NOTE: o_ref is intentionally NOT touched in phase 0 — its block is
        # pinned to index 0 here, so nothing is written back to HBM.

    @pl.when(p == 1)
    def _phase1():
        @pl.when(b == 0)
        def _finalize():
            inv_n = jnp.float32(1.0 / n_valid)
            mean = sum_ref[...] * inv_n
            var = jnp.maximum(sq_ref[...] * inv_n - mean * mean, 0.0)
            scale = gamma_ref[...] * jax.lax.rsqrt(var + eps)
            scale_ref[...] = scale
            shift_ref[...] = beta_ref[...] - mean * scale

        h = h_ref[b].astype(jnp.float32)                         # (TB, H)
        h = jnp.maximum(h * scale_ref[...] + shift_ref[...], 0.0)
        out = jnp.dot(h.astype(jnp.bfloat16), w2_ref[...],
                      preferred_element_type=jnp.float32)        # (TB, Np)
        out = out + b2_ref[...]
        if not train:
            out = jnp.tanh(jnp.clip(out, -1.0, 1.0))
        o_ref[...] = out.astype(o_ref.dtype)


def _tiled_vmem_limit_bytes(nb, TB, D_in, H, Np):
    need = (nb * TB * H * 2          # bf16 h scratch (persistent)
            + 2 * D_in * H * 2       # W1 bf16 (double-buffer worst case)
            + 2 * H * Np * 2         # W2 bf16
            + 2 * TB * D_in * 4      # x tile f32, double-buffered
            + 2 * TB * Np * 4        # out tile f32, double-buffered
            + 16 * H * 4             # BN vectors + stats scratch + headroom
            + 4 * Np * 4)
    need += 4 << 20                  # compiler temporaries slack
    cap = 100 << 20                  # fine for v5e/v6e (128 MiB physical)
    try:
        cap = min(cap, int(pltpu.get_tpu_info().vmem_capacity_bytes) * 7 // 8)
    except Exception:
        cap = 56 << 20               # conservative (v7x: 64 MiB physical)
    return int(max(32 << 20, min(need, cap)))


def erm_fc_forward(x, w1, b1, gamma, beta, w2, b2, train=True):
    """x: (B, D_in); w1: (D_in, H); w2: (H, D_out); b1/gamma/beta: (H,); b2: (D_out,).

    `b1` is accepted for API parity but unused: it is cancelled exactly by the
    batch-mean subtraction of training-mode (batch-statistics) BatchNorm.
    """
    del b1  # cancelled by batch-statistics BN
    B, D_in = x.shape
    H = w1.shape[1]
    D_out = w2.shape[1]
    Np = _round_up(D_out, 128)                      # lane-dense output width

    # Parameter prep (tiny; one-time per call).
    x = x.astype(jnp.float32)                       # cast to bf16 inside kernel
    w1_b = w1.astype(jnp.bfloat16)
    w2_p = jnp.zeros((H, Np), jnp.bfloat16).at[:, :D_out].set(w2.astype(jnp.bfloat16))
    b2_p = jnp.zeros((1, Np), jnp.float32).at[:, :D_out].set(
        b2.reshape(1, D_out).astype(jnp.float32))
    g_r = gamma.reshape(1, H).astype(jnp.float32)
    bt_r = beta.reshape(1, H).astype(jnp.float32)

    # ---- Small-batch fast path: one grid step, no phases, no h round-trip. --
    if B <= 256:
        kernel = functools.partial(_erm_fc_small_kernel, train=train, n_valid=B)
        out = pl.pallas_call(
            kernel,
            out_shape=jax.ShapeDtypeStruct((B, Np), jnp.float32),
        )(x, w1_b, g_r, bt_r, w2_p, b2_p)
        return out[:, :D_out]

    # ---- Large-batch two-phase path. ----------------------------------------
    TB = 512 if B > 512 else 256
    B_pad = _round_up(B, TB)
    nb = B_pad // TB
    if B_pad != B:
        # Zero rows contribute nothing to the streamed stats (b1 dropped).
        x = jnp.pad(x, ((0, B_pad - B), (0, 0)))

    kernel = functools.partial(_erm_fc_tiled_kernel, train=train, n_valid=B)

    grid_spec = pltpu.PrefetchScalarGridSpec(
        num_scalar_prefetch=0,
        grid=(2, nb),                               # (phase, batch-tile)
        in_specs=[
            # x tiles stream during phase 0; pinned to tile 0 in phase 1.
            pl.BlockSpec((TB, D_in), lambda p, b: ((1 - p) * b, 0)),
            # Weights / BN params: constant index_map -> VMEM-resident.
            pl.BlockSpec((D_in, H), lambda p, b: (0, 0)),
            pl.BlockSpec((1, H), lambda p, b: (0, 0)),
            pl.BlockSpec((1, H), lambda p, b: (0, 0)),
            pl.BlockSpec((H, Np), lambda p, b: (0, 0)),
            pl.BlockSpec((1, Np), lambda p, b: (0, 0)),
        ],
        # Output block pinned to 0 in phase 0 (never written / never flushed);
        # written once per tile in phase 1. Revisits are consecutive.
        out_specs=pl.BlockSpec((TB, Np), lambda p, b: (p * b, 0)),
        scratch_shapes=[
            pltpu.VMEM((nb, TB, H), jnp.bfloat16),  # h = x @ W1, whole batch
            pltpu.VMEM((1, H), jnp.float32),        # sum(h)
            pltpu.VMEM((1, H), jnp.float32),        # sum(h*h)
            pltpu.VMEM((1, H), jnp.float32),        # BN scale
            pltpu.VMEM((1, H), jnp.float32),        # BN shift
        ],
    )

    out = pl.pallas_call(
        kernel,
        out_shape=jax.ShapeDtypeStruct((B_pad, Np), jnp.float32),
        grid_spec=grid_spec,
        compiler_params=pltpu.CompilerParams(
            # BN couples all rows and phase 1 depends on all of phase 0, so
            # both grid axes are sequential on one TensorCore.
            dimension_semantics=("arbitrary", "arbitrary"),
            vmem_limit_bytes=_tiled_vmem_limit_bytes(nb, TB, D_in, H, Np)),
    )(x, w1_b, g_r, bt_r, w2_p, b2_p)

    return out[:B, :D_out]


def _ref_forward(x, w1, b1, gamma, beta, w2, b2, train=True, eps=1e-5,
                 bf16_matmul=False):
    """Pure-JAX reference of the PyTorch module (includes the redundant b1)."""
    if bf16_matmul:
        h = jnp.dot(x.astype(jnp.bfloat16), w1.astype(jnp.bfloat16),
                    preferred_element_type=jnp.float32) + b1
    else:
        h = x @ w1 + b1
    mean = h.mean(axis=0, keepdims=True)
    var = ((h - mean) ** 2).mean(axis=0, keepdims=True)
    h = (h - mean) / jnp.sqrt(var + eps)
    h = h * gamma + beta
    h = jnp.maximum(h, 0.0)
    if bf16_matmul:
        out = jnp.dot(h.astype(jnp.bfloat16), w2.astype(jnp.bfloat16),
                      preferred_element_type=jnp.float32) + b2
    else:
        out = h @ w2 + b2
    if not train:
        out = jnp.tanh(jnp.clip(out, -1.0, 1.0))
    return out


if __name__ == "__main__":
    # Shapes consistent with ERM_FC: erm_input_dim=32 -> hidden=640,
    # erm_output_dim=8, batch=8 (small-batch fast path).
    B, D_in, D_out = 8, 32, 8
    H = D_in * 20  # 640

    key = jax.random.PRNGKey(0)
    kx, kw1, kb1, kw2, kb2, kxl = jax.random.split(key, 6)

    x = jax.random.normal(kx, (B, D_in), dtype=jnp.float32)

    # PyTorch nn.Linear default init: U(-1/sqrt(fan_in), 1/sqrt(fan_in)).
    lim1 = 1.0 / jnp.sqrt(jnp.float32(D_in))
    w1 = jax.random.uniform(kw1, (D_in, H), jnp.float32, -lim1, lim1)
    b1 = jax.random.uniform(kb1, (H,), jnp.float32, -lim1, lim1)

    lim2 = 1.0 / jnp.sqrt(jnp.float32(H))
    w2 = jax.random.uniform(kw2, (H, D_out), jnp.float32, -lim2, lim2)
    b2 = jax.random.uniform(kb2, (D_out,), jnp.float32, -lim2, lim2)

    # BatchNorm1d affine params at init: gamma=1, beta=0.
    gamma = jnp.ones((H,), jnp.float32)
    beta = jnp.zeros((H,), jnp.float32)

    # --- Small-batch path (B=8): train and eval tails. -----------------------
    out_train = jax.block_until_ready(
        erm_fc_forward(x, w1, b1, gamma, beta, w2, b2, train=True))
    out_eval = jax.block_until_ready(
        erm_fc_forward(x, w1, b1, gamma, beta, w2, b2, train=False))
    assert out_train.shape == (B, D_out)
    assert out_eval.shape == (B, D_out)

    # Tight check vs precision-matched reference (bf16 operands, f32 accum).
    ref_train_bf = _ref_forward(x, w1, b1, gamma, beta, w2, b2, train=True,
                                bf16_matmul=True)
    ref_eval_bf = _ref_forward(x, w1, b1, gamma, beta, w2, b2, train=False,
                               bf16_matmul=True)
    assert jnp.allclose(out_train, ref_train_bf, atol=5e-3, rtol=5e-3)
    assert jnp.allclose(out_eval, ref_eval_bf, atol=5e-3, rtol=5e-3)

    # Looser sanity check vs full-f32 reference.
    ref_train_f32 = _ref_forward(x, w1, b1, gamma, beta, w2, b2, train=True)
    ref_eval_f32 = _ref_forward(x, w1, b1, gamma, beta, w2, b2, train=False)
    assert jnp.allclose(out_train, ref_train_f32, atol=3e-2, rtol=3e-2)
    assert jnp.allclose(out_eval, ref_eval_f32, atol=3e-2, rtol=3e-2)

    # --- Two-phase tiled path (B > 256, non-multiple of TB, bf16 h scratch). -
    BL = 640
    xl = jax.random.normal(kxl, (BL, D_in), dtype=jnp.float32)
    out_l = jax.block_until_ready(
        erm_fc_forward(xl, w1, b1, gamma, beta, w2, b2, train=True))
    assert out_l.shape == (BL, D_out)
    ref_l = _ref_forward(xl, w1, b1, gamma, beta, w2, b2, train=True,
                         bf16_matmul=True)
    assert jnp.allclose(out_l, ref_l, atol=2e-2, rtol=2e-2)

    print("KERNEL_OK")
</pallas_src>

<mosaic_0001>
module attributes {stable_mosaic.version = 11 : i64} {
  func.func @_erm_fc_small_kernel(%arg0: memref<8x32xf32, #tpu.memory_space<vmem>>, %arg1: memref<32x640xbf16, #tpu.memory_space<vmem>>, %arg2: memref<1x640xf32, #tpu.memory_space<vmem>>, %arg3: memref<1x640xf32, #tpu.memory_space<vmem>>, %arg4: memref<640x128xbf16, #tpu.memory_space<vmem>>, %arg5: memref<1x128xf32, #tpu.memory_space<vmem>>, %arg6: memref<8x128xf32, #tpu.memory_space<vmem>>) attributes {dimension_semantics = [], scalar_prefetch = 0 : i64, scratch_operands = 0 : i64, tpu.core_type = #tpu.core_type<tc>} {
    %c0 = arith.constant 0 : index
    %c0_0 = arith.constant 0 : index
    %0 = vector.load %arg0[%c0, %c0_0] : memref<8x32xf32, #tpu.memory_space<vmem>>, vector<8x32xf32>
    %1 = arith.truncf %0 : vector<8x32xf32> to vector<8x32xbf16>
    %c0_1 = arith.constant 0 : index
    %c0_2 = arith.constant 0 : index
    %2 = vector.load %arg1[%c0_1, %c0_2] : memref<32x640xbf16, #tpu.memory_space<vmem>>, vector<32x640xbf16>
    %cst = arith.constant dense<0.000000e+00> : vector<8x640xf32>
    %3 = tpu.matmul %1, %2, %cst {dimension_numbers = #tpu.dot_dimension_numbers<[1], [0], [0], [1], [0, 0, 1, 1], [], []>} : vector<8x32xbf16>, vector<32x640xbf16>, vector<8x640xf32> -> vector<8x640xf32>
    %cst_3 = arith.constant dense<0.000000e+00> : vector<640xf32>
    %4 = vector.multi_reduction <add>, %3, %cst_3 [0] : vector<8x640xf32> to vector<640xf32>
    %5 = vector.shape_cast %4 : vector<640xf32> to vector<1x640xf32>
    %cst_4 = arith.constant 1.250000e-01 : f32
    %6 = vector.broadcast %cst_4 : f32 to vector<1x640xf32>
    %7 = arith.mulf %5, %6 : vector<1x640xf32>
    %8 = arith.mulf %3, %3 : vector<8x640xf32>
    %cst_5 = arith.constant dense<0.000000e+00> : vector<640xf32>
    %9 = vector.multi_reduction <add>, %8, %cst_5 [0] : vector<8x640xf32> to vector<640xf32>
    %10 = vector.shape_cast %9 : vector<640xf32> to vector<1x640xf32>
    %cst_6 = arith.constant 1.250000e-01 : f32
    %11 = vector.broadcast %cst_6 : f32 to vector<1x640xf32>
    %12 = arith.mulf %10, %11 : vector<1x640xf32>
    %13 = arith.mulf %7, %7 : vector<1x640xf32>
    %14 = arith.subf %12, %13 : vector<1x640xf32>
    %cst_7 = arith.constant 0.000000e+00 : f32
    %15 = vector.broadcast %cst_7 : f32 to vector<1x640xf32>
    %16 = arith.maximumf %14, %15 : vector<1x640xf32>
    %c0_8 = arith.constant 0 : index
    %c0_9 = arith.constant 0 : index
    %17 = vector.load %arg2[%c0_8, %c0_9] : memref<1x640xf32, #tpu.memory_space<vmem>>, vector<1x640xf32>
    %cst_10 = arith.constant 9.99999974E-6 : f32
    %18 = vector.broadcast %cst_10 : f32 to vector<1x640xf32>
    %19 = arith.addf %16, %18 : vector<1x640xf32>
    %20 = math.rsqrt %19 : vector<1x640xf32>
    %21 = arith.mulf %17, %20 : vector<1x640xf32>
    %c0_11 = arith.constant 0 : index
    %c0_12 = arith.constant 0 : index
    %22 = vector.load %arg3[%c0_11, %c0_12] : memref<1x640xf32, #tpu.memory_space<vmem>>, vector<1x640xf32>
    %23 = arith.mulf %7, %21 : vector<1x640xf32>
    %24 = arith.subf %22, %23 : vector<1x640xf32>
    %25 = vector.broadcast %21 : vector<1x640xf32> to vector<8x640xf32>
    %26 = arith.mulf %3, %25 : vector<8x640xf32>
    %27 = vector.broadcast %24 : vector<1x640xf32> to vector<8x640xf32>
    %28 = arith.addf %26, %27 : vector<8x640xf32>
    %cst_13 = arith.constant 0.000000e+00 : f32
    %29 = vector.broadcast %cst_13 : f32 to vector<8x640xf32>
    %30 = arith.maximumf %28, %29 : vector<8x640xf32>
    %31 = arith.truncf %30 : vector<8x640xf32> to vector<8x640xbf16>
    %c0_14 = arith.constant 0 : index
    %c0_15 = arith.constant 0 : index
    %32 = vector.load %arg4[%c0_14, %c0_15] : memref<640x128xbf16, #tpu.memory_space<vmem>>, vector<640x128xbf16>
    %cst_16 = arith.constant dense<0.000000e+00> : vector<8x128xf32>
    %33 = tpu.matmul %31, %32, %cst_16 {dimension_numbers = #tpu.dot_dimension_numbers<[1], [0], [0], [1], [0, 0, 1, 1], [], []>} : vector<8x640xbf16>, vector<640x128xbf16>, vector<8x128xf32> -> vector<8x128xf32>
    %c0_17 = arith.constant 0 : index
    %c0_18 = arith.constant 0 : index
    %34 = vector.load %arg5[%c0_17, %c0_18] : memref<1x128xf32, #tpu.memory_space<vmem>>, vector<1x128xf32>
    %35 = vector.broadcast %34 : vector<1x128xf32> to vector<8x128xf32>
    %36 = arith.addf %33, %35 : vector<8x128xf32>
    %c0_19 = arith.constant 0 : index
    %c0_20 = arith.constant 0 : index
    %37 = vector.load %arg6[%c0_19, %c0_20] : memref<8x128xf32, #tpu.memory_space<vmem>>, vector<8x128xf32>
    tpu.vector_store %arg6[%c0_19, %c0_20], %36 {strides = array<i32>} : memref<8x128xf32, #tpu.memory_space<vmem>>, vector<8x128xf32>,
    return
  }
}

</mosaic_0001>

<bundles_post_ra>
// kernel: tpu_custom_call.1
= control target key start
LH: loop header
LB: loop body
LE: loop exit
PB: predicated region body
PF: predicated region fallthrough
CT: control target
= control target key end

     0   :  { %11 = vsyncpa [#allocation3], 0  ;;  %s1475_s0 = inlined_call_operand.hbm [shape: f32[8,32], index: 0, kind: input, shape index: {}]   ;;  %s1476_s1 = inlined_call_operand.hbm [shape: bf16[32,640], index: 1, kind: input, shape index: {}]   ;;  %s1477_s2 = inlined_call_operand.vmem [shape: f32[1,640], index: 2, kind: input, shape index: {}]   ;;  %s1478_s3 = inlined_call_operand.vmem [shape: f32[1,640], index: 3, kind: input, shape index: {}]   ;;  %s1479_s4 = inlined_call_operand.hbm [shape: bf16[640,128], index: 4, kind: input, shape index: {}]   ;;  %s1480_s5 = inlined_call_operand.vmem [shape: f32[1,128], index: 5, kind: input, shape index: {}]   ;;  %s1481_s6 = inlined_call_operand.hbm [shape: f32[8,128], index: 6, kind: output, shape index: {}]  }
   0x1   :  { %12 = vsyncpa [#allocation6], 0 }
   0x2   :  { %13 = vsyncpa [#allocation4], 0  ;;  %s1299_s21 = smov [#allocation5]   ;;  %s1205_s25 = scalar_lea.hbm %s1476_s1, 1280 }
   0x3   :  { %s29_s22 = sshll.u32 %s1299_s21, 4  ;;  %p1206_p0 = scmp.ne.s32.totalorder %s1476_s1, %s1205_s25  ;;  %s30_s22 = int_to_ptr.vmem [resolvable:$true] %s29_s22 }
   0x4   :  { %p1209_p1 = scmp.lt.u32.totalorder %s1205_s25, %s1476_s1 }
   0x6   :  { %p1211_p2 = pnand %p1209_p1, %p1206_p0 }
   0x8   :  { %1214 = shalt.err (!%p1211_p2)
}
   0x9   :  { %s1215_s30 = scalar_lea.vmem %s30_s22, 1280  ;;  %p1220_p4 = scmp.lt.s32.totalorder %s30_s22, %s30_s22 }
   0xa   :  { %p1216_p3 = scmp.ne.s32.totalorder %s30_s22, %s1215_s30  ;;  %p1221_p5 = scmp.lt.s32.totalorder %s1215_s30, %s1215_s30 }
   0xc   :  { %p1222_p6 = por %p1221_p5, %p1220_p4 }
   0xe   :  { %p1223_p7 = pnand %p1222_p6, %p1216_p3 }
  0x10   :  { %1226 = shalt.err (!%p1223_p7)
}
  0x11   :  { %s1300_s7 = smov 320   ;;  %s1301_s8 = smov 20  }
  0x12   :  { %35 = dma.hbm_to_vmem [thread:$0]  %s1476_s1, 1280, %s30_s22, [#allocation6], %s1300_s7, %s1300_s7, %s1301_s8  }
  0x13   :  { %s1302_s11 = smov [#allocation2]   ;;  %s1303_s13 = smov [#allocation7]  }
  0x14   :  { %s20_s12 = sshll.u32 %s1302_s11, 4  ;;  %s45_s14 = sshll.u32 %s1303_s13, 4  ;;  %s21_s12 = int_to_ptr.vmem [resolvable:$true] %s20_s12  ;;  %s46_s14 = int_to_ptr.vmem [resolvable:$true] %s45_s14 }
  0x15   :  { %s1227_s17 = scalar_lea.hbm %s1475_s0, 128 }
  0x16   :  { %p1228_p8 = scmp.ne.s32.totalorder %s1475_s0, %s1227_s17  ;;  %p1231_p9 = scmp.lt.u32.totalorder %s1227_s17, %s1475_s0 }
  0x18   :  { %p1233_p10 = pnand %p1231_p9, %p1228_p8 }
  0x1a   :  { %1236 = shalt.err (!%p1233_p10)
}
  0x1b   :  { %s1237_s1 = scalar_lea.vmem %s21_s12, 128  ;;  %p1242_p12 = scmp.lt.s32.totalorder %s21_s12, %s21_s12 }
  0x1c   :  { %p1238_p11 = scmp.ne.s32.totalorder %s21_s12, %s1237_s1  ;;  %p1243_p13 = scmp.lt.s32.totalorder %s1237_s1, %s1237_s1 }
  0x1e   :  { %p1244_p0 = por %p1243_p13, %p1242_p12 }
  0x20   :  { %p1245_p1 = pnand %p1244_p0, %p1238_p11 }
  0x22   :  { %1248 = shalt.err (!%p1245_p1)
}
  0x23   :  { %23 = dma.hbm_to_vmem [thread:$0]  %s1475_s0, 128, %s21_s12, [#allocation3]  }
  0x24   :  { %s1249_s26 = scalar_lea.hbm %s1479_s4, 5120 }
  0x25   :  { %p1250_p2 = scmp.ne.s32.totalorder %s1479_s4, %s1249_s26  ;;  %p1253_p3 = scmp.lt.u32.totalorder %s1249_s26, %s1479_s4 }
  0x27   :  { %p1255_p4 = pnand %p1253_p3, %p1250_p2 }
  0x29   :  { %1258 = shalt.err (!%p1255_p4)
}
  0x2a   :  { %s1259_s7 = scalar_lea.vmem %s46_s14, 5120  ;;  %p1264_p6 = scmp.lt.s32.totalorder %s46_s14, %s46_s14 }
  0x2b   :  { %p1260_p5 = scmp.ne.s32.totalorder %s46_s14, %s1259_s7  ;;  %p1265_p7 = scmp.lt.s32.totalorder %s1259_s7, %s1259_s7 }
  0x2d   :  { %p1266_p8 = por %p1265_p7, %p1264_p6 }
  0x2f   :  { %p1267_p9 = pnand %p1266_p8, %p1260_p5 }
  0x31   :  { %1270 = shalt.err (!%p1267_p9)
}
  0x32   :  { %s1304_s0 = smov 64   ;;  %s1305_s8 = smov 4  }
  0x33   :  { %51 = dma.hbm_to_vmem [thread:$0]  %s1479_s4, 5120, %s46_s14, [#allocation6], %s1304_s0, %s1304_s0, %s1305_s8  }
  0x34   :  { %1293 = dma.done.wait [#allocation3], 128  }
  0x35   :  { %1294 = vsyncadd [#allocation3], 4294967168 }
  0x36   :  { %1295 = dma.done.wait [#allocation6], 6400  }
  0x37   :  { %1296 = vsyncadd [#allocation6], 4294960896  ;;  %v1306_v0 = vmov 0   ;;  %v1141_v1 = vld [vmem:[#allocation5 + $0x4] ss:$20 sps:$4 sm:$0xff]   ;;  %vm130_vm0 = vcmask 261120  }
  0x38   :  { %166 = vmatprep.mubr.bf16.mxu0 %v1306_v0  ;;  %v1143_v2 = vld [vmem:[#allocation5] ss:$20 sps:$4 sm:$0xff]   ;;  %134 = vmatprep.subr.bf16.mxu0 %v1141_v1  ;;  %v1146_v4 = vld [vmem:[#allocation5 + $0x28] ss:$20 sps:$4 sm:$0xff]   ;;  %v1150_v10 = vld [vmem:[#allocation5 + $0x30] ss:$20 sps:$4 sm:$0xff]  }
  0x39   :  { %v1144_v3 = vld [vmem:[#allocation5 + $0x2c] ss:$20 sps:$4 sm:$0xff]   ;;  %135 = vmatpush1.bf16.msra.mxu0 %v1143_v2  ;;  %v64_v5 = vld [vmem:[#allocation2] sm:$0xff]  ;;  %v1152_v9 = vld [vmem:[#allocation5 + $0x34] ss:$20 sps:$4 sm:$0xff]   ;;  %v1307_v12 = vmov 0.0  }
  0x3a   :  { %136 = vmatprep.subr.bf16.mxu0 %v1144_v3  ;;  %v1149_v6 = vld [vmem:[#allocation5 + $0xc] ss:$20 sps:$4 sm:$0xff]   ;;  %v65_v7 = vpack.c.bf16 %v64_v5, %v64_v5  ;;  %v1147_v8 = vld [vmem:[#allocation5 + $0x8] ss:$20 sps:$4 sm:$0xff]   ;;  %v1153_v11 = vld [vmem:[#allocation5 + $0x10] ss:$20 sps:$4 sm:$0xff]  }
  0x3b   :  { %v1154_v13 = vld [vmem:[#allocation5 + $0x38] ss:$20 sps:$4 sm:$0xff]   ;;  %vm1308_vm1 = vmmov 0   ;;  %v1155_v14 = vld [vmem:[#allocation7 + $0x40] sm:$0xff]   ;;  %v1163_v22 = vld [vmem:[#allocation7 + $0x50] sm:$0xff]   ;;  %s1310_s14 = smov [#allocation8]  }
  0x3c   :  { %v1156_v15 = vld [vmem:[#allocation7] sm:$0xff]   ;;  %1048 = vmatprep.subr.bf16.mxu1 %v1155_v14  ;;  %v1159_v18 = vld [vmem:[#allocation7 + $0x48] sm:$0xff]   ;;  %v1164_v23 = vld [vmem:[#allocation7 + $0x10] sm:$0xff]   ;;  %s981_s15 = sshll.u32 %s1310_s14, 4  ;;  %s982_s15 = int_to_ptr.vmem [resolvable:$true] %s981_s15 }
  0x3d   :  { %137 = vmatpush1.bf16.msra.mxu0 %v1146_v4  ;;  %v1157_v16 = vld [vmem:[#allocation7 + $0xc0] sm:$0xff]   ;;  %1049 = vmatpush3.bf16.msra.mxu1 %v1156_v15  ;;  %v1160_v19 = vld [vmem:[#allocation7 + $0x8] sm:$0xff]   ;;  %v1165_v24 = vld [vmem:[#allocation7 + $0xd0] sm:$0xff]   ;;  %p1276_p11 = scmp.lt.s32.totalorder %s982_s15, %s982_s15 }
  0x3e   :  { %175 = vmatprep.subr.bf16.mxu0 %v1149_v6  ;;  %v1158_v17 = vld [vmem:[#allocation7 + $0x80] sm:$0xff]   ;;  %v1161_v20 = vld [vmem:[#allocation7 + $0xc8] sm:$0xff]   ;;  %1050 = vmatprep.subr.bf16.mxu1 %v1159_v18  ;;  %v1166_v25 = vld [vmem:[#allocation7 + $0x90] sm:$0xff]  }
  0x3f   :  { %v1162_v21 = vld [vmem:[#allocation7 + $0x88] sm:$0xff]   ;;  %v1167_v26 = vld [vmem:[#allocation7 + $0x58] sm:$0xff]   ;;  %v1171_v30 = vld [vmem:[#allocation7 + $0x60] sm:$0xff]  }
  0x40   :  { %1001 = vmatmul.mubr.msk.bf16.vlgmr.msra.gmra.mrb[0].mxu0 %vm130_vm0, %v65_v7  ;;  %v1168_v27 = vld [vmem:[#allocation7 + $0x18] sm:$0xff]   ;;  %v1172_v31 = vld [vmem:[#allocation7 + $0x20] sm:$0xff]   ;;  %v1175_v34 = vld [vmem:[#allocation7 + $0x68] sm:$0xff]  }
  0x41   :  { %176 = vmatpush1.bf16.msra.mxu0 %v1147_v8  ;;  %207 = vmatprep.mubr.bf16.mxu0 %v1306_v0  ;;  %v1169_v28 = vld [vmem:[#allocation7 + $0xd8] sm:$0xff]   ;;  %v1173_v32 = vld [vmem:[#allocation7 + $0xe0] sm:$0xff]   ;;  %v1177_v35 = vld [vmem:[#allocation7 + $0xe8] sm:$0xff]  }
  0x42   :  { %177 = vmatprep.subr.bf16.mxu0 %v1152_v9  ;;  %1051 = vmatpush3.bf16.msra.mxu1 %v1160_v19  ;;  %v1170_v29 = vld [vmem:[#allocation7 + $0x98] sm:$0xff]   ;;  %v1174_v33 = vld [vmem:[#allocation7 + $0xa0] sm:$0xff]   ;;  %v1176_v36 = vld [vmem:[#allocation7 + $0x28] sm:$0xff]  }
  0x43   :  { %1052 = vmatprep.subr.bf16.mxu1 %v1163_v22  ;;  %v1178_v37 = vld [vmem:[#allocation7 + $0xa8] sm:$0xff]   ;;  %v1179_v38 = vld [vmem:[#allocation7 + $0x70] sm:$0xff]   ;;  %v1183_v42 = vld [vmem:[#allocation7 + $0x78] sm:$0xff]  }
  0x44   :  { %v1181_v39 = vld [vmem:[#allocation7 + $0xf0] sm:$0xff]   ;;  %v1185_v43 = vld [vmem:[#allocation7 + $0xf8] sm:$0xff]  }
  0x45   :  { %178 = vmatpush1.bf16.msra.mxu0 %v1150_v10  ;;  %v1180_v40 = vld [vmem:[#allocation7 + $0x30] sm:$0xff]   ;;  %v1184_v44 = vld [vmem:[#allocation7 + $0x38] sm:$0xff]  }
  0x46   :  { %1101 = vmatprep.subr.bf16.mxu0 %v1307_v12  ;;  %1053 = vmatpush3.bf16.msra.mxu1 %v1164_v23  ;;  %v1182_v41 = vld [vmem:[#allocation7 + $0xb0] sm:$0xff]   ;;  %v1186_v45 = vld [vmem:[#allocation7 + $0xb8] sm:$0xff]  }
  0x47   :  { %1054 = vmatprep.subr.bf16.mxu1 %v1167_v26 }
  0x48   :  { %1002 = vmatmul.mubr.msk.bf16.vlgmr.msra.gmra.mrb[4].mxu0 %vm130_vm0, %v65_v7 }
  0x49   :  { %1102 = vmatpush3.bf16.msra.mxu0 %v1153_v11  ;;  %1105 = vmatprep.mubr.msk.bf16.mxu0 %vm1308_vm1, %v1307_v12 }
  0x4a   :  { %1103 = vmatprep.subr.bf16.mxu0 %v1307_v12  ;;  %1055 = vmatpush3.bf16.msra.mxu1 %v1168_v27 }
  0x4b   :  { %1056 = vmatprep.subr.bf16.mxu1 %v1171_v30 }
  0x4d   :  { %1104 = vmatpush3.bf16.msra.mxu0 %v1154_v13 }
  0x4e   :  { %1070 = vmatprep.subr.bf16.mxu0 %v1157_v16  ;;  %1057 = vmatpush3.bf16.msra.mxu1 %v1172_v31 }
  0x4f   :  { %1058 = vmatprep.subr.bf16.mxu1 %v1175_v34 }
  0x50   :  { %1106 = vmatmul.mubr.msk.bf16.vlgmr.msra.gmra.mrb[8].mxu0 %vm130_vm0, %v65_v7 }
  0x51   :  { %1071 = vmatpush3.bf16.msra.mxu0 %v1158_v17 }
  0x52   :  { %1072 = vmatprep.subr.bf16.mxu0 %v1161_v20  ;;  %1059 = vmatpush3.bf16.msra.mxu1 %v1176_v36 }
  0x53   :  { %1060 = vmatprep.subr.bf16.mxu1 %v1179_v38 }
  0x55   :  { %1073 = vmatpush3.bf16.msra.mxu0 %v1162_v21 }
  0x56   :  { %1074 = vmatprep.subr.bf16.mxu0 %v1165_v24  ;;  %1061 = vmatpush3.bf16.msra.mxu1 %v1180_v40 }
  0x57   :  { %1062 = vmatprep.subr.bf16.mxu1 %v1183_v42 }
  0x59   :  { %1075 = vmatpush3.bf16.msra.mxu0 %v1166_v25 }
  0x5a   :  { %1076 = vmatprep.subr.bf16.mxu0 %v1169_v28  ;;  %1063 = vmatpush3.bf16.msra.mxu1 %v1184_v44 }
  0x5b   :  { %1109 = vmatprep.subr.bf16.mxu1 %v1307_v12 }
  0x5d   :  { %1077 = vmatpush3.bf16.msra.mxu0 %v1170_v29 }
  0x5e   :  { %1078 = vmatprep.subr.bf16.mxu0 %v1173_v32 }
  0x61   :  { %1079 = vmatpush3.bf16.msra.mxu0 %v1174_v33 }
  0x62   :  { %1080 = vmatprep.subr.bf16.mxu0 %v1177_v35 }
  0x65   :  { %1081 = vmatpush3.bf16.msra.mxu0 %v1178_v37 }
  0x66   :  { %1082 = vmatprep.subr.bf16.mxu0 %v1181_v39 }
  0x69   :  { %1083 = vmatpush3.bf16.msra.mxu0 %v1182_v41 }
  0x6a   :  { %1084 = vmatprep.subr.bf16.mxu0 %v1185_v43 }
  0x6d   :  { %1085 = vmatpush3.bf16.msra.mxu0 %v1186_v45 }
 0x113   :  { %v1390_v46 = vpop.f32.mrb[0].mxu0 }
 0x114   :  { %v256_v47 = vrot.slane %v1390_v46, 4  ;;  %v291_v48 = vmul.f32 %v1390_v46, %v1390_v46  ;;  %v1395_v49 = vpop.f32.mrb[1].mxu0 }
 0x115   :  { %v262_v50 = vrot.slane %v1395_v49, 4  ;;  %v292_v51 = vmul.f32 %v1395_v49, %v1395_v49  ;;  %v172_v52 = vpop.f32.mrb[2].mxu0 }
 0x116   :  { %v257_v53 = vadd.f32 %v256_v47, %v1390_v46  ;;  %v296_v54 = vrot.slane %v291_v48, 4  ;;  %v173_v55 = vpop.f32.mrb[3].mxu0 }
 0x117   :  { %v263_v56 = vadd.f32 %v262_v50, %v1395_v49  ;;  %v302_v57 = vrot.slane %v292_v51, 4 }
 0x118   :  { %v258_v58 = vrot.slane %v257_v53, 2  ;;  %v297_v59 = vadd.f32 %v296_v54, %v291_v48 }
 0x119   :  { %v264_v60 = vrot.slane %v263_v56, 2  ;;  %v303_v61 = vadd.f32 %v302_v57, %v292_v51 }
 0x11a   :  { %v259_v62 = vadd.f32 %v258_v58, %v257_v53  ;;  %v298_v63 = vrot.slane %v297_v59, 2 }
 0x11b   :  { %v265_v0 = vadd.f32 %v264_v60, %v263_v56  ;;  %v304_v1 = vrot.slane %v303_v61, 2  ;;  %v1402_v2 = vpop.f32.mrb[4].mxu0 }
 0x11c   :  { %v260_v3 = vrot.slane %v259_v62, 1  ;;  %v299_v4 = vadd.f32 %v298_v63, %v297_v59  ;;  %v268_v5 = vrot.slane %v1402_v2, 4  ;;  %v293_v6 = vmul.f32 %v1402_v2, %v1402_v2  ;;  %v1407_v7 = vpop.f32.mrb[5].mxu0 }
 0x11d   :  { %v266_v8 = vrot.slane %v265_v0, 1  ;;  %v305_v9 = vadd.f32 %v304_v1, %v303_v61  ;;  %v274_v10 = vrot.slane %v1407_v7, 4  ;;  %v294_v11 = vmul.f32 %v1407_v7, %v1407_v7  ;;  %v213_v13 = vpop.f32.mrb[6].mxu0 }
 0x11e   :  { %v261_v14 = vadd.f32 %v260_v3, %v259_v62  ;;  %v300_v15 = vrot.slane %v299_v4, 1  ;;  %v269_v16 = vadd.f32 %v268_v5, %v1402_v2  ;;  %v308_v17 = vrot.slane %v293_v6, 4  ;;  %v214_v18 = vpop.f32.mrb[7].mxu0 }
 0x11f   :  { %v267_v19 = vadd.f32 %v266_v8, %v265_v0  ;;  %v306_v20 = vrot.slane %v305_v9, 1  ;;  %v275_v21 = vadd.f32 %v274_v10, %v1407_v7  ;;  %v314_v22 = vrot.slane %v294_v11, 4 }
 0x120   :  { %v1414_v23 = vmul.f32 0.125, %v261_v14  ;;  %v301_v24 = vadd.f32 %v300_v15, %v299_v4  ;;  %v270_v25 = vrot.slane %v269_v16, 2  ;;  %v309_v26 = vadd.f32 %v308_v17, %v293_v6 }
 0x121   :  { %v1416_v27 = vmul.f32 0.125, %v267_v19  ;;  %v307_v28 = vadd.f32 %v306_v20, %v305_v9  ;;  %v276_v29 = vrot.slane %v275_v21, 2  ;;  %v315_v30 = vadd.f32 %v314_v22, %v294_v11 }
 0x122   :  { %v326_v31 = vmul.f32 0.125, %v301_v24  ;;  %v331_v32 = vmul.f32 %v1414_v23, %v1414_v23  ;;  %v271_v33 = vadd.f32 %v270_v25, %v269_v16  ;;  %v310_v34 = vrot.slane %v309_v26, 2 }
 0x123   :  { %v327_v35 = vmul.f32 0.125, %v307_v28  ;;  %v332_v36 = vmul.f32 %v1416_v27, %v1416_v27  ;;  %v277_v37 = vadd.f32 %v276_v29, %v275_v21  ;;  %v316_v38 = vrot.slane %v315_v30, 2  ;;  %v1422_v39 = vpop.f32.mrb[8].mxu0 }
 0x124   :  { %v336_v40 = vsub.f32 %v326_v31, %v331_v32  ;;  %v272_v41 = vrot.slane %v271_v33, 1  ;;  %v311_v42 = vadd.f32 %v310_v34, %v309_v26  ;;  %v280_v43 = vrot.slane %v1422_v39, 4  ;;  %v1107_v44 = vpop.f32.mrb[9].mxu0 }
 0x125   :  { %v337_v45 = vsub.f32 %v327_v35, %v332_v36  ;;  %v278_v47 = vrot.slane %v277_v37, 1  ;;  %v317_v48 = vadd.f32 %v316_v38, %v315_v30  ;;  %v295_v50 = vmul.f32 %v1422_v39, %v1422_v39  ;;  %v253_v51 = vpop.f32.mrb[10].mxu0 }
 0x126   :  { %v341_v52 = vmax.f32 %v336_v40, 0.0  ;;  %v273_v53 = vadd.f32 %v272_v41, %v271_v33  ;;  %v312_v54 = vrot.slane %v311_v42, 1  ;;  %v281_v55 = vadd.f32 %v280_v43, %v1422_v39  ;;  %v1108_v56 = vpop.f32.mrb[11].mxu0 }
 0x127   :  { %v342_v57 = vmax.f32 %v337_v45, 0.0  ;;  %v279_v58 = vadd.f32 %v278_v47, %v277_v37  ;;  %v318_v59 = vrot.slane %v317_v48, 1  ;;  %v320_v60 = vrot.slane %v295_v50, 4 }
 0x128   :  { %v347_v61 = vadd.f32 1e-05, %v341_v52  ;;  %v1428_v62 = vmul.f32 0.125, %v273_v53  ;;  %v313_v63 = vadd.f32 %v312_v54, %v311_v42  ;;  %v282_v0 = vrot.slane %v281_v55, 2 }
 0x129   :  { %v348_v1 = vadd.f32 1e-05, %v342_v57  ;;  %v1430_v3 = vmul.f32 0.125, %v279_v58  ;;  %v319_v4 = vadd.f32 %v318_v59, %v317_v48  ;;  %v321_v5 = vadd.f32 %v320_v60, %v295_v50 }
 0x12a   :  { %1195 = vrsqrt.f32 %v347_v61  ;;  %v328_v6 = vmul.f32 0.125, %v313_v63  ;;  %v333_v8 = vmul.f32 %v1428_v62, %v1428_v62  ;;  %v283_v9 = vadd.f32 %v282_v0, %v281_v55  ;;  %v346_v55 = vld [vmem:[%s1477_s2] sm:$0x1f] }
 0x12b   :  { %1197 = vrsqrt.f32 %v348_v1  ;;  %v329_v10 = vmul.f32 0.125, %v319_v4  ;;  %v334_v11 = vmul.f32 %v1430_v3, %v1430_v3  ;;  %v322_v13 = vrot.slane %v321_v5, 2 }
 0x12c   :  { %v338_v14 = vsub.f32 %v328_v6, %v333_v8  ;;  %v284_v15 = vrot.slane %v283_v9, 1  ;;  %v1309_v31 = vmov 1966171168   ;;  %v367_v33 = vlaneseq }
 0x12d   :  { %v339_v16 = vsub.f32 %v329_v10, %v334_v11  ;;  %v323_v17 = vadd.f32 %v322_v13, %v321_v5  ;;  %v365_v32 = vunpack.c.l.s4 %v1309_v31 }
 0x12e   :  { %v343_v18 = vmax.f32 %v338_v14, 0.0  ;;  %v285_v19 = vadd.f32 %v284_v15, %v283_v9  ;;  %v368_v40 = vshrl.u32 %v367_v33, 7 }
 0x12f   :  { %v344_v20 = vmax.f32 %v339_v16, 0.0  ;;  %v324_v21 = vrot.slane %v323_v17, 1  ;;  %v366_v38 = vunpack.c.0.s8 %v365_v32 }
 0x130   :  { %v349_v22 = vadd.f32 1e-05, %v343_v18  ;;  %v290_v24 = vmul.f32 0.125, %v285_v19  ;;  %v423_v56 = vsub.s32 4, %v368_v40  ;;  %v407_v58 = vsub.s32 0, %v368_v40 }
 0x131   :  { %v350_v25 = vadd.f32 1e-05, %v344_v20  ;;  %v325_v26 = vadd.f32 %v324_v21, %v323_v17  ;;  %v369_v43 = vsub.s32 %v366_v38, %v368_v40  ;;  %v411_v59 = vsub.s32 1, %v368_v40 }
 0x132   :  { %1199 = vrsqrt.f32 %v349_v22  ;;  %v335_v28 = vmul.f32 %v290_v24, %v290_v24  ;;  %v415_v60 = vsub.s32 2, %v368_v40  ;;  %v419_v61 = vsub.s32 3, %v368_v40 }
 0x133   :  { %1201 = vrsqrt.f32 %v350_v25  ;;  %v330_v29 = vmul.f32 0.125, %v325_v26 }
 0x134   :  { %v1196_v30 = vpop.eup %1195 }
 0x135   :  { %v1198_v34 = vpop.eup %1197  ;;  %v340_v35 = vsub.f32 %v330_v29, %v335_v28 }
 0x136   :  { %v362_v36 = vcombine.low %v1196_v30, %v1198_v34 }
 0x137   :  { %v345_v37 = vmax.f32 %v340_v35, 0.0 }
 0x138   :  { %v370_v47 = vrot.slane %v362_v36, %v369_v43 }
 0x139   :  { %v351_v41 = vadd.f32 1e-05, %v345_v37 }
 0x13b   :  { %1203 = vrsqrt.f32 %v351_v41 }
 0x13c   :  { %v1200_v42 = vpop.eup %1199 }
 0x13d   :  { %v1202_v44 = vpop.eup %1201 }
 0x13e   :  { %v363_v45 = vcombine.low %v1200_v42, %v1202_v44  ;;  %v1187_v42 = vld [vmem:[#allocation7 + $0x100] sm:$0xff]   ;;  %v1189_v44 = vld [vmem:[#allocation7 + $0x110] sm:$0xff]  }
 0x140   :  { %v377_v48 = vrot.slane %v363_v45, %v369_v43  ;;  %v1190_v45 = vld [vmem:[#allocation7 + $0x118] sm:$0xff]  }
 0x142   :  { %v385_v50 = vcombine.low %v370_v47, %v377_v48  ;;  %v1191_v47 = vld [vmem:[#allocation7 + $0x120] sm:$0xff]   ;;  %v1192_v48 = vld [vmem:[#allocation7 + $0x128] sm:$0xff]  }
 0x144   :  { %v392_v53 = vrot.slane %v385_v50, %v369_v43  ;;  %v1193_v50 = vld [vmem:[#allocation7 + $0x130] sm:$0xff]  }
 0x145   :  { %v1204_v51 = vpop.eup %1203 }
 0x146   :  { %v384_v52 = vrot.slane %v1204_v51, %v369_v43  ;;  %v1194_v51 = vld [vmem:[#allocation7 + $0x138] sm:$0xff]  }
 0x148   :  { %v399_v54 = vrot.slane %v384_v52, %v369_v43 }
 0x14a   :  { %v400_v57 = vcombine.low %v392_v53, %v399_v54 }
 0x14c   :  { %v402_v63 = vmul.f32 %v400_v57, %v346_v55 }
 0x14e   :  { %v424_v0 = vrot.slane %v402_v63, %v423_v56  ;;  %v408_v1 = vrot.slane %v402_v63, %v407_v58  ;;  %v412_v4 = vrot.slane %v402_v63, %v411_v59  ;;  %v416_v5 = vrot.slane %v402_v63, %v415_v60 }
 0x14f   :  { %v420_v6 = vrot.slane %v402_v63, %v419_v61 }
 0x150   :  { %v434_v8 = vmul.f32 %v424_v0, %v290_v24  ;;  %v485_v9 = vmul.f32 %v424_v0, %v1422_v39  ;;  %v430_v10 = vmul.f32 %v408_v1, %v1414_v23  ;;  %v431_v11 = vmul.f32 %v412_v4, %v1416_v27 }
 0x151   :  { %v432_v13 = vmul.f32 %v416_v5, %v1428_v62  ;;  %v433_v14 = vmul.f32 %v420_v6, %v1430_v3  ;;  %v482_v15 = vmul.f32 %v412_v4, %v1395_v49  ;;  %v484_v16 = vmul.f32 %v420_v6, %v1407_v7  ;;  %v403_v62 = vld [vmem:[%s1478_s3] sm:$0x1f] }
 0x152   :  { %v440_v17 = vcombine.low %v430_v10, %v431_v11  ;;  %v481_v18 = vmul.f32 %v408_v1, %v1390_v46  ;;  %v483_v19 = vmul.f32 %v416_v5, %v1402_v2  ;;  %v462_v39 = vrot.slane %v434_v8, %v369_v43 }
 0x153   :  { %v441_v20 = vcombine.low %v432_v13, %v433_v14 }
 0x154   :  { %v448_v21 = vrot.slane %v440_v17, %v369_v43  ;;  %v477_v24 = vrot.slane %v462_v39, %v369_v43 }
 0x155   :  { %v455_v22 = vrot.slane %v441_v20, %v369_v43 }
 0x157   :  { %v463_v23 = vcombine.low %v448_v21, %v455_v22 }
 0x159   :  { %v470_v27 = vrot.slane %v463_v23, %v369_v43  ;;  %v1188_v43 = vld [vmem:[#allocation7 + $0x108] sm:$0xff]  }
 0x15b   :  { %v478_v3 = vcombine.low %v470_v27, %v477_v24 }
 0x15d   :  { %v480_v49 = vsub.f32 %v403_v62, %v478_v3 }
 0x15f   :  { %v494_v25 = vrot.slane %v480_v49, %v411_v59  ;;  %v502_v7 = vrot.slane %v480_v49, %v419_v61  ;;  %v490_v26 = vrot.slane %v480_v49, %v407_v58  ;;  %v498_v28 = vrot.slane %v480_v49, %v415_v60 }
 0x160   :  { %v506_v46 = vrot.slane %v480_v49, %v423_v56  ;;  %v1004_v56 = vld [vmem:[%s1480_s5] ss:$0 sm:$0xff]  ;;  %s1271_s5 = scalar_lea.vmem %s982_s15, 128 }
 0x161   :  { %v513_v29 = vadd.f32 %v494_v25, %v482_v15  ;;  %v515_v2 = vadd.f32 %v502_v7, %v484_v16  ;;  %v512_v30 = vadd.f32 %v490_v26, %v481_v18  ;;  %v514_v31 = vadd.f32 %v498_v28, %v483_v19  ;;  %p1272_p10 = scmp.ne.s32.totalorder %s982_s15, %s1271_s5  ;;  %p1277_p12 = scmp.lt.s32.totalorder %s1271_s5, %s1271_s5 }
 0x162   :  { %v516_v32 = vadd.f32 %v506_v46, %v485_v9 }
 0x163   :  { %v518_v33 = vmax.f32 %v513_v29, 0.0  ;;  %v520_v34 = vmax.f32 %v515_v2, 0.0  ;;  %v517_v35 = vmax.f32 %v512_v30, 0.0  ;;  %v519_v36 = vmax.f32 %v514_v31, 0.0  ;;  %p1278_p13 = por %p1277_p12, %p1276_p11 }
 0x164   :  { %v521_v52 = vmax.f32 %v516_v32, 0.0 }
 0x165   :  { %v523_v37 = vpack.c.bf16 %v518_v33, %v518_v33  ;;  %v525_v38 = vpack.c.bf16 %v520_v34, %v520_v34  ;;  %v522_v40 = vpack.c.bf16 %v517_v35, %v517_v35  ;;  %v524_v41 = vpack.c.bf16 %v519_v36, %v519_v36  ;;  %p1279_p0 = pnand %p1278_p13, %p1272_p10 }
 0x166   :  { %v526_v53 = vpack.c.bf16 %v521_v52, %v521_v52 }
 0x167   :  { %886 = vmatprep.mubr.bf16.mxu1 %v523_v37  ;;  %926 = vmatprep.mubr.bf16.mxu0 %v525_v38 }
 0x168   :  { %887 = vmatmul.mubr.bf16.vlgmr.msra.gmra.mrb[0].mxu1 %v522_v40  ;;  %927 = vmatmul.mubr.bf16.vlgmr.msra.gmra.mrb[12].mxu0 %v524_v41 }
 0x169   :  { %1110 = vmatpush3.bf16.msra.mxu1 %v1187_v42  ;;  %1125 = vmatprep.mubr.msk.bf16.mxu1 %vm1308_vm1, %v1307_v12 }
 0x16a   :  { %1111 = vmatprep.subr.bf16.mxu1 %v1307_v12 }
 0x16d   :  { %1112 = vmatpush3.bf16.msra.mxu1 %v1188_v43 }
 0x16e   :  { %1113 = vmatprep.subr.bf16.mxu1 %v1307_v12 }
 0x171   :  { %1114 = vmatpush3.bf16.msra.mxu1 %v1189_v44 }
 0x172   :  { %1115 = vmatprep.subr.bf16.mxu1 %v1307_v12 }
 0x175   :  { %1116 = vmatpush3.bf16.msra.mxu1 %v1190_v45 }
 0x176   :  { %1117 = vmatprep.subr.bf16.mxu1 %v1307_v12 }
 0x179   :  { %1118 = vmatpush3.bf16.msra.mxu1 %v1191_v47 }
 0x17a   :  { %1119 = vmatprep.subr.bf16.mxu1 %v1307_v12 }
 0x17d   :  { %1120 = vmatpush3.bf16.msra.mxu1 %v1192_v48 }
 0x17e   :  { %1121 = vmatprep.subr.bf16.mxu1 %v1307_v12 }
 0x181   :  { %1122 = vmatpush3.bf16.msra.mxu1 %v1193_v50 }
 0x182   :  { %1123 = vmatprep.subr.bf16.mxu1 %v1307_v12 }
 0x185   :  { %1124 = vmatpush3.bf16.msra.mxu1 %v1194_v51 }
 0x188   :  { %1126 = vmatmul.mubr.bf16.vlgmr.msra.gmra.mrb[4].mxu1 %v526_v53 }
 0x23b   :  { %v1064_v54 = vpop.f32.mrb[0].mxu1  ;;  %v1086_v55 = vpop.f32.mrb[12].mxu0 }
 0x23c   :  { %v1065_v57 = vpop.f32.mrb[1].mxu1  ;;  %v1087_v58 = vpop.f32.mrb[13].mxu0 }
 0x23d   :  { %v1066_v59 = vadd.f32 %v1065_v57, %v1064_v54  ;;  %v1088_v60 = vadd.f32 %v1087_v58, %v1086_v55  ;;  %v1067_v61 = vpop.f32.mrb[2].mxu1  ;;  %v1089_v63 = vpop.f32.mrb[14].mxu0 }
 0x23e   :  { %v1068_v0 = vpop.f32.mrb[3].mxu1  ;;  %v1090_v1 = vpop.f32.mrb[15].mxu0 }
 0x23f   :  { %v889_v4 = vadd.f32 %v1066_v59, %v1004_v56 }
 0x241   :  { %v929_v12 = vadd.f32 %v1088_v60, %v889_v4 }
 0x25b   :  { %v968_v5 = vpop.f32.mrb[4].mxu1 }
 0x25c   :  { %v969_v6 = vadd.f32 %v968_v5, %v929_v12  ;;  %v1127_v8 = vpop.f32.mrb[5].mxu1 }
 0x25d   :  { %v971_v9 = vpop.f32.mrb[6].mxu1 }
 0x25e   :  { %974 = vst [vmem:[#allocation8] sm:$0xff] %v969_v6  ;;  %v1128_v10 = vpop.f32.mrb[7].mxu1 }
 0x25f   :  { %1282 = shalt.err (!%p1279_p0)
}
 0x260   :  { %s1283_s18 = scalar_lea.hbm %s1481_s6, 128 }
 0x261   :  { %p1284_p1 = scmp.ne.s32.totalorder %s1481_s6, %s1283_s18  ;;  %p1287_p2 = scmp.lt.u32.totalorder %s1283_s18, %s1481_s6 }
 0x263   :  { %p1289_p3 = pnand %p1287_p2, %p1284_p1 }
 0x265   :  { %1292 = shalt.err (!%p1289_p3)
}
 0x266   :  { %984 = dma.vmem_to_hbm [thread:$0]  %s982_s15, 128, %s1481_s6, [#allocation4]  }
 0x267   :  { %1297 = dma.done.wait [#allocation4], 128  }
 0x268   :  { %1298 = vsyncadd [#allocation4], 4294967168 }
 0x269   :  { %988 = vsyncpa [#allocation3], 1 }
 0x26a   :  { %989 = vsyncpa [#allocation6], 1 }
 0x26b   :  { %990 = vsyncpa [#allocation4], 1 }

</bundles_post_ra>
